<compile_context>
chip_gen: v7x
topology: tpu7x:2x2x1
jax: 0.10.0
libtpu: 0.0.40
codegen_flags: <defaults>
</compile_context>

<pallas_src>
import math
import functools

import jax
import jax.numpy as jnp
from jax.experimental import pallas as pl
from jax.experimental.pallas import tpu as pltpu


def _self_attention_kernel(g_ref, p_ref, wq_ref, wk_ref, wv_ref,
                           bq_ref, bk_ref, bv_ref, o_ref,
                           *, num_heads, head_dim, scale, use_bf16_matmul):
    # g_ref: (bb, Sq, H), p_ref: (bb, Sk, H), w*_ref: (H, H), b*_ref: (1, H)
    # o_ref: (bb, Sq, H)
    bb, Sq, H = g_ref.shape
    _, Sk, _ = p_ref.shape

    # Fold the batch tile into the row axis: one big (bb*S, H) @ (H, H) MXU matmul
    # per projection instead of bb tiny ones.
    g2 = g_ref[...].reshape(bb * Sq, H)
    x2 = p_ref[...].reshape(bb * Sk, H)

    wq = wq_ref[...]
    wk = wk_ref[...]
    wv = wv_ref[...]
    if use_bf16_matmul:  # v6e/v7x MXU peak is bf16-only; accumulation stays f32
        g2, x2 = g2.astype(jnp.bfloat16), x2.astype(jnp.bfloat16)
        wq, wk, wv = (w.astype(jnp.bfloat16) for w in (wq, wk, wv))

    q = jnp.dot(g2, wq, preferred_element_type=jnp.float32) + bq_ref[...]
    k = jnp.dot(x2, wk, preferred_element_type=jnp.float32) + bk_ref[...]
    v = jnp.dot(x2, wv, preferred_element_type=jnp.float32) + bv_ref[...]

    # Fold 1/sqrt(head_dim) into q: scales bb*Sq*H elements instead of bb*Sq*Sk/head.
    q = (q * scale).reshape(bb, Sq, H)
    k = k.reshape(bb, Sk, H)
    v = v.reshape(bb, Sk, H)

    mm_dtype = jnp.bfloat16 if use_bf16_matmul else jnp.float32

    # Per-head attention (num_heads is a static Python int -> unrolled). Contexts are
    # collected in registers and concatenated so the output ref receives exactly one
    # full-width, lane-dense store (no masked sub-lane writes, no scratch slab).
    ctxs = []
    for h in range(num_heads):
        lo = h * head_dim
        qs = q[:, :, lo:lo + head_dim].astype(mm_dtype)   # (bb, Sq, d)
        ks = k[:, :, lo:lo + head_dim].astype(mm_dtype)   # (bb, Sk, d)
        vs = v[:, :, lo:lo + head_dim]                    # (bb, Sk, d)

        # Q @ K^T expressed as a contraction over d — no physical transpose of K.
        s = jnp.einsum('bqd,bkd->bqk', qs, ks,
                       preferred_element_type=jnp.float32)        # (bb, Sq, Sk)

        # Numerically-stable softmax over keys (kept in f32); reciprocal on the EUP.
        m = jnp.max(s, axis=-1, keepdims=True)
        e = jnp.exp(s - m)
        denom = jnp.sum(e, axis=-1, keepdims=True)
        probs = e * pl.reciprocal(denom, approx=True)

        # TODO(synk): nn.Dropout on attention_probs is identity in eval mode (what we
        # implement); training-mode dropout would need pltpu.prng_random_bits masking.

        ctx = jnp.einsum('bqk,bkd->bqd',
                         probs.astype(mm_dtype), vs.astype(mm_dtype),
                         preferred_element_type=jnp.float32)      # (bb, Sq, d)
        ctxs.append(ctx)

    # Single full-width store (== permute(0,2,1,3).contiguous().view(..., H)).
    o_ref[...] = jnp.concatenate(ctxs, axis=-1).astype(o_ref.dtype)


def _pick_batch_block(B, Sq, Sk, H, budget_bytes=8 * 1024 * 1024):
    """Largest divisor of B whose per-step f32 working set fits a VMEM budget."""
    per_b = 4 * (3 * Sq * H + 3 * Sk * H + 2 * Sq * Sk)
    bb = 1
    for cand in range(1, B + 1):
        if B % cand == 0 and cand * per_b <= budget_bytes:
            bb = cand
    return bb


def self_attention(graph_output, plm_output, wq, bq, wk, bk, wv, bv, num_heads,
                   *, use_bf16_matmul=False):
    B, Sq, H = graph_output.shape
    _, Sk, _ = plm_output.shape
    assert H % num_heads == 0
    d = H // num_heads

    bb = _pick_batch_block(B, Sq, Sk, H)
    grid = (B // bb,)

    kernel = functools.partial(_self_attention_kernel,
                               num_heads=num_heads, head_dim=d,
                               scale=1.0 / math.sqrt(d),
                               use_bf16_matmul=use_bf16_matmul)

    bq2 = bq.reshape(1, H)
    bk2 = bk.reshape(1, H)
    bv2 = bv.reshape(1, H)

    # Rough per-step VMEM footprint: double-buffered blocks + weights + intermediates.
    block_bytes = 4 * (2 * bb * Sq * H + bb * Sk * H + 3 * H * H + 3 * H)
    work_bytes = 4 * bb * (2 * Sq * H + 2 * Sk * H + 2 * Sq * Sk)
    vmem_need = 2 * block_bytes + work_bytes
    cp_kwargs = {"dimension_semantics": ("parallel",)}
    if vmem_need > 12 * 1024 * 1024:
        cp_kwargs["vmem_limit_bytes"] = int(min(2 * vmem_need, 64 * 1024 * 1024))

    return pl.pallas_call(
        kernel,
        out_shape=jax.ShapeDtypeStruct((B, Sq, H), jnp.float32),
        grid=grid,
        in_specs=[
            pl.BlockSpec((bb, Sq, H), lambda i: (i, 0, 0)),   # graph_output tile
            pl.BlockSpec((bb, Sk, H), lambda i: (i, 0, 0)),   # plm_output tile
            pl.BlockSpec((H, H), lambda i: (0, 0)),           # Wq
            pl.BlockSpec((H, H), lambda i: (0, 0)),           # Wk
            pl.BlockSpec((H, H), lambda i: (0, 0)),           # Wv
            pl.BlockSpec((1, H), lambda i: (0, 0)),           # bq
            pl.BlockSpec((1, H), lambda i: (0, 0)),           # bk
            pl.BlockSpec((1, H), lambda i: (0, 0)),           # bv
        ],
        out_specs=pl.BlockSpec((bb, Sq, H), lambda i: (i, 0, 0)),
        compiler_params=pltpu.CompilerParams(**cp_kwargs),
    )(graph_output, plm_output, wq, wk, wv, bq2, bk2, bv2)


def _reference(graph_output, plm_output, wq, bq, wk, bk, wv, bv, num_heads):
    # Pure-JAX reference mirroring the PyTorch forward (dropout in eval mode = identity).
    B, Sq, H = graph_output.shape
    _, Sk, _ = plm_output.shape
    d = H // num_heads
    q = graph_output @ wq + bq
    k = plm_output @ wk + bk
    v = plm_output @ wv + bv
    q = q.reshape(B, Sq, num_heads, d).transpose(0, 2, 1, 3)
    k = k.reshape(B, Sk, num_heads, d).transpose(0, 2, 1, 3)
    v = v.reshape(B, Sk, num_heads, d).transpose(0, 2, 1, 3)
    s = jnp.einsum('bhqd,bhkd->bhqk', q, k) / math.sqrt(d)
    p = jax.nn.softmax(s, axis=-1)
    ctx = jnp.einsum('bhqk,bhkd->bhqd', p, v)
    return ctx.transpose(0, 2, 1, 3).reshape(B, Sq, H)


if __name__ == "__main__":
    # Small shapes consistent with the module's forward:
    B, Sq, Sk, H, num_heads = 2, 8, 8, 32, 4
    dropout_prob = 0.1  # eval-mode dropout -> identity

    key = jax.random.PRNGKey(0)
    kg, kp, k1, k2, k3, k4, k5, k6 = jax.random.split(key, 8)

    graph_output = jax.random.normal(kg, (B, Sq, H), dtype=jnp.float32)
    plm_output = jax.random.normal(kp, (B, Sk, H), dtype=jnp.float32)

    # Deterministic parameter init (PyTorch Linear-like uniform bound), stored as (in, out).
    bound = 1.0 / math.sqrt(H)
    wq = jax.random.uniform(k1, (H, H), jnp.float32, -bound, bound)
    wk = jax.random.uniform(k2, (H, H), jnp.float32, -bound, bound)
    wv = jax.random.uniform(k3, (H, H), jnp.float32, -bound, bound)
    bq = jax.random.uniform(k4, (H,), jnp.float32, -bound, bound)
    bk = jax.random.uniform(k5, (H,), jnp.float32, -bound, bound)
    bv = jax.random.uniform(k6, (H,), jnp.float32, -bound, bound)

    out = self_attention(graph_output, plm_output, wq, bq, wk, bk, wv, bv, num_heads)
    out = jax.block_until_ready(out)

    ref = _reference(graph_output, plm_output, wq, bq, wk, bk, wv, bv, num_heads)
    assert out.shape == (B, Sq, H)
    # Tolerance accounts for pl.reciprocal(approx=True) in the softmax normalization.
    assert jnp.allclose(out, ref, atol=2e-3, rtol=2e-3), "mismatch vs reference"

    print("KERNEL_OK")
</pallas_src>

<mosaic_0001>
module attributes {stable_mosaic.version = 11 : i64} {
  func.func @_self_attention_kernel(%arg0: i32, %arg1: memref<2x8x32xf32, #tpu.memory_space<vmem>>, %arg2: memref<2x8x32xf32, #tpu.memory_space<vmem>>, %arg3: memref<32x32xf32, #tpu.memory_space<vmem>>, %arg4: memref<32x32xf32, #tpu.memory_space<vmem>>, %arg5: memref<32x32xf32, #tpu.memory_space<vmem>>, %arg6: memref<1x32xf32, #tpu.memory_space<vmem>>, %arg7: memref<1x32xf32, #tpu.memory_space<vmem>>, %arg8: memref<1x32xf32, #tpu.memory_space<vmem>>, %arg9: memref<2x8x32xf32, #tpu.memory_space<vmem>>) attributes {dimension_semantics = [#tpu.dimension_semantics<parallel>], iteration_bounds = array<i64: 1>, scalar_prefetch = 0 : i64, scratch_operands = 0 : i64, tpu.core_type = #tpu.core_type<tc>, window_params = [{transform_indices = @transform_0, window_bounds = array<i64: 2, 8, 32>}, {transform_indices = @transform_1, window_bounds = array<i64: 2, 8, 32>}, {pipeline_mode = #tpu.pipeline_mode<synchronous>, transform_indices = @transform_2, window_bounds = array<i64: 32, 32>}, {pipeline_mode = #tpu.pipeline_mode<synchronous>, transform_indices = @transform_3, window_bounds = array<i64: 32, 32>}, {pipeline_mode = #tpu.pipeline_mode<synchronous>, transform_indices = @transform_4, window_bounds = array<i64: 32, 32>}, {pipeline_mode = #tpu.pipeline_mode<synchronous>, transform_indices = @transform_5, window_bounds = array<i64: 1, 32>}, {pipeline_mode = #tpu.pipeline_mode<synchronous>, transform_indices = @transform_6, window_bounds = array<i64: 1, 32>}, {pipeline_mode = #tpu.pipeline_mode<synchronous>, transform_indices = @transform_7, window_bounds = array<i64: 1, 32>}, {transform_indices = @transform_8, window_bounds = array<i64: 2, 8, 32>}]} {
    %c0 = arith.constant 0 : index
    %c0_0 = arith.constant 0 : index
    %c0_1 = arith.constant 0 : index
    %0 = vector.load %arg1[%c0, %c0_0, %c0_1] : memref<2x8x32xf32, #tpu.memory_space<vmem>>, vector<2x8x32xf32>
    %1 = vector.shape_cast %0 : vector<2x8x32xf32> to vector<16x32xf32>
    %c0_2 = arith.constant 0 : index
    %c0_3 = arith.constant 0 : index
    %c0_4 = arith.constant 0 : index
    %2 = vector.load %arg2[%c0_2, %c0_3, %c0_4] : memref<2x8x32xf32, #tpu.memory_space<vmem>>, vector<2x8x32xf32>
    %3 = vector.shape_cast %2 : vector<2x8x32xf32> to vector<16x32xf32>
    %c0_5 = arith.constant 0 : index
    %c0_6 = arith.constant 0 : index
    %4 = vector.load %arg3[%c0_5, %c0_6] : memref<32x32xf32, #tpu.memory_space<vmem>>, vector<32x32xf32>
    %c0_7 = arith.constant 0 : index
    %c0_8 = arith.constant 0 : index
    %5 = vector.load %arg4[%c0_7, %c0_8] : memref<32x32xf32, #tpu.memory_space<vmem>>, vector<32x32xf32>
    %c0_9 = arith.constant 0 : index
    %c0_10 = arith.constant 0 : index
    %6 = vector.load %arg5[%c0_9, %c0_10] : memref<32x32xf32, #tpu.memory_space<vmem>>, vector<32x32xf32>
    %cst = arith.constant dense<0.000000e+00> : vector<16x32xf32>
    %7 = tpu.matmul %1, %4, %cst {dimension_numbers = #tpu.dot_dimension_numbers<[1], [0], [0], [1], [0, 0, 1, 1], [], []>} : vector<16x32xf32>, vector<32x32xf32>, vector<16x32xf32> -> vector<16x32xf32>
    %c0_11 = arith.constant 0 : index
    %c0_12 = arith.constant 0 : index
    %8 = vector.load %arg6[%c0_11, %c0_12] : memref<1x32xf32, #tpu.memory_space<vmem>>, vector<1x32xf32>
    %9 = vector.broadcast %8 : vector<1x32xf32> to vector<16x32xf32>
    %10 = arith.addf %7, %9 : vector<16x32xf32>
    %cst_13 = arith.constant dense<0.000000e+00> : vector<16x32xf32>
    %11 = tpu.matmul %3, %5, %cst_13 {dimension_numbers = #tpu.dot_dimension_numbers<[1], [0], [0], [1], [0, 0, 1, 1], [], []>} : vector<16x32xf32>, vector<32x32xf32>, vector<16x32xf32> -> vector<16x32xf32>
    %c0_14 = arith.constant 0 : index
    %c0_15 = arith.constant 0 : index
    %12 = vector.load %arg7[%c0_14, %c0_15] : memref<1x32xf32, #tpu.memory_space<vmem>>, vector<1x32xf32>
    %13 = vector.broadcast %12 : vector<1x32xf32> to vector<16x32xf32>
    %14 = arith.addf %11, %13 : vector<16x32xf32>
    %cst_16 = arith.constant dense<0.000000e+00> : vector<16x32xf32>
    %15 = tpu.matmul %3, %6, %cst_16 {dimension_numbers = #tpu.dot_dimension_numbers<[1], [0], [0], [1], [0, 0, 1, 1], [], []>} : vector<16x32xf32>, vector<32x32xf32>, vector<16x32xf32> -> vector<16x32xf32>
    %c0_17 = arith.constant 0 : index
    %c0_18 = arith.constant 0 : index
    %16 = vector.load %arg8[%c0_17, %c0_18] : memref<1x32xf32, #tpu.memory_space<vmem>>, vector<1x32xf32>
    %17 = vector.broadcast %16 : vector<1x32xf32> to vector<16x32xf32>
    %18 = arith.addf %15, %17 : vector<16x32xf32>
    %cst_19 = arith.constant 0.353553385 : f32
    %19 = vector.broadcast %cst_19 : f32 to vector<16x32xf32>
    %20 = arith.mulf %10, %19 : vector<16x32xf32>
    %21 = vector.shape_cast %20 : vector<16x32xf32> to vector<2x8x32xf32>
    %22 = vector.shape_cast %14 : vector<16x32xf32> to vector<2x8x32xf32>
    %23 = vector.shape_cast %18 : vector<16x32xf32> to vector<2x8x32xf32>
    %24 = vector.extract_strided_slice %21 {offsets = [0, 0, 0], sizes = [2, 8, 8], strides = [1, 1, 1]} : vector<2x8x32xf32> to vector<2x8x8xf32>
    %25 = vector.extract_strided_slice %22 {offsets = [0, 0, 0], sizes = [2, 8, 8], strides = [1, 1, 1]} : vector<2x8x32xf32> to vector<2x8x8xf32>
    %26 = vector.extract_strided_slice %23 {offsets = [0, 0, 0], sizes = [2, 8, 8], strides = [1, 1, 1]} : vector<2x8x32xf32> to vector<2x8x8xf32>
    "tpu.trace_start"() <{level = 10 : i32, message = "bqd,bkd->bqk"}> : () -> ()
    %cst_20 = arith.constant dense<0.000000e+00> : vector<2x8x8xf32>
    %27 = tpu.matmul %24, %25, %cst_20 {dimension_numbers = #tpu.dot_dimension_numbers<[2], [2], [1], [1], [0, 0, 0, 1, 1, 1], [0], [0]>} : vector<2x8x8xf32>, vector<2x8x8xf32>, vector<2x8x8xf32> -> vector<2x8x8xf32>
    "tpu.trace_stop"() : () -> ()
    %cst_21 = arith.constant dense<0xFF800000> : vector<2x8xf32>
    %28 = vector.multi_reduction <maximumf>, %27, %cst_21 [2] : vector<2x8x8xf32> to vector<2x8xf32>
    %29 = vector.shape_cast %28 : vector<2x8xf32> to vector<2x8x1xf32>
    %30 = vector.broadcast %29 : vector<2x8x1xf32> to vector<2x8x8xf32>
    %31 = arith.subf %27, %30 : vector<2x8x8xf32>
    %32 = math.exp %31 : vector<2x8x8xf32>
    %cst_22 = arith.constant dense<0.000000e+00> : vector<2x8xf32>
    %33 = vector.multi_reduction <add>, %32, %cst_22 [2] : vector<2x8x8xf32> to vector<2x8xf32>
    %34 = vector.shape_cast %33 : vector<2x8xf32> to vector<2x8x1xf32>
    %35 = tpu.reciprocal %34 {approx = true} : vector<2x8x1xf32> -> vector<2x8x1xf32>
    %36 = vector.broadcast %35 : vector<2x8x1xf32> to vector<2x8x8xf32>
    %37 = arith.mulf %32, %36 : vector<2x8x8xf32>
    "tpu.trace_start"() <{level = 10 : i32, message = "bqk,bkd->bqd"}> : () -> ()
    %cst_23 = arith.constant dense<0.000000e+00> : vector<2x8x8xf32>
    %38 = tpu.matmul %37, %26, %cst_23 {dimension_numbers = #tpu.dot_dimension_numbers<[2], [1], [1], [2], [0, 0, 0, 1, 1, 2], [0], [0]>} : vector<2x8x8xf32>, vector<2x8x8xf32>, vector<2x8x8xf32> -> vector<2x8x8xf32>
    "tpu.trace_stop"() : () -> ()
    %39 = vector.extract_strided_slice %21 {offsets = [0, 0, 8], sizes = [2, 8, 8], strides = [1, 1, 1]} : vector<2x8x32xf32> to vector<2x8x8xf32>
    %40 = vector.extract_strided_slice %22 {offsets = [0, 0, 8], sizes = [2, 8, 8], strides = [1, 1, 1]} : vector<2x8x32xf32> to vector<2x8x8xf32>
    %41 = vector.extract_strided_slice %23 {offsets = [0, 0, 8], sizes = [2, 8, 8], strides = [1, 1, 1]} : vector<2x8x32xf32> to vector<2x8x8xf32>
    "tpu.trace_start"() <{level = 10 : i32, message = "bqd,bkd->bqk"}> : () -> ()
    %cst_24 = arith.constant dense<0.000000e+00> : vector<2x8x8xf32>
    %42 = tpu.matmul %39, %40, %cst_24 {dimension_numbers = #tpu.dot_dimension_numbers<[2], [2], [1], [1], [0, 0, 0, 1, 1, 1], [0], [0]>} : vector<2x8x8xf32>, vector<2x8x8xf32>, vector<2x8x8xf32> -> vector<2x8x8xf32>
    "tpu.trace_stop"() : () -> ()
    %cst_25 = arith.constant dense<0xFF800000> : vector<2x8xf32>
    %43 = vector.multi_reduction <maximumf>, %42, %cst_25 [2] : vector<2x8x8xf32> to vector<2x8xf32>
    %44 = vector.shape_cast %43 : vector<2x8xf32> to vector<2x8x1xf32>
    %45 = vector.broadcast %44 : vector<2x8x1xf32> to vector<2x8x8xf32>
    %46 = arith.subf %42, %45 : vector<2x8x8xf32>
    %47 = math.exp %46 : vector<2x8x8xf32>
    %cst_26 = arith.constant dense<0.000000e+00> : vector<2x8xf32>
    %48 = vector.multi_reduction <add>, %47, %cst_26 [2] : vector<2x8x8xf32> to vector<2x8xf32>
    %49 = vector.shape_cast %48 : vector<2x8xf32> to vector<2x8x1xf32>
    %50 = tpu.reciprocal %49 {approx = true} : vector<2x8x1xf32> -> vector<2x8x1xf32>
    %51 = vector.broadcast %50 : vector<2x8x1xf32> to vector<2x8x8xf32>
    %52 = arith.mulf %47, %51 : vector<2x8x8xf32>
    "tpu.trace_start"() <{level = 10 : i32, message = "bqk,bkd->bqd"}> : () -> ()
    %cst_27 = arith.constant dense<0.000000e+00> : vector<2x8x8xf32>
    %53 = tpu.matmul %52, %41, %cst_27 {dimension_numbers = #tpu.dot_dimension_numbers<[2], [1], [1], [2], [0, 0, 0, 1, 1, 2], [0], [0]>} : vector<2x8x8xf32>, vector<2x8x8xf32>, vector<2x8x8xf32> -> vector<2x8x8xf32>
    "tpu.trace_stop"() : () -> ()
    %54 = vector.extract_strided_slice %21 {offsets = [0, 0, 16], sizes = [2, 8, 8], strides = [1, 1, 1]} : vector<2x8x32xf32> to vector<2x8x8xf32>
    %55 = vector.extract_strided_slice %22 {offsets = [0, 0, 16], sizes = [2, 8, 8], strides = [1, 1, 1]} : vector<2x8x32xf32> to vector<2x8x8xf32>
    %56 = vector.extract_strided_slice %23 {offsets = [0, 0, 16], sizes = [2, 8, 8], strides = [1, 1, 1]} : vector<2x8x32xf32> to vector<2x8x8xf32>
    "tpu.trace_start"() <{level = 10 : i32, message = "bqd,bkd->bqk"}> : () -> ()
    %cst_28 = arith.constant dense<0.000000e+00> : vector<2x8x8xf32>
    %57 = tpu.matmul %54, %55, %cst_28 {dimension_numbers = #tpu.dot_dimension_numbers<[2], [2], [1], [1], [0, 0, 0, 1, 1, 1], [0], [0]>} : vector<2x8x8xf32>, vector<2x8x8xf32>, vector<2x8x8xf32> -> vector<2x8x8xf32>
    "tpu.trace_stop"() : () -> ()
    %cst_29 = arith.constant dense<0xFF800000> : vector<2x8xf32>
    %58 = vector.multi_reduction <maximumf>, %57, %cst_29 [2] : vector<2x8x8xf32> to vector<2x8xf32>
    %59 = vector.shape_cast %58 : vector<2x8xf32> to vector<2x8x1xf32>
    %60 = vector.broadcast %59 : vector<2x8x1xf32> to vector<2x8x8xf32>
    %61 = arith.subf %57, %60 : vector<2x8x8xf32>
    %62 = math.exp %61 : vector<2x8x8xf32>
    %cst_30 = arith.constant dense<0.000000e+00> : vector<2x8xf32>
    %63 = vector.multi_reduction <add>, %62, %cst_30 [2] : vector<2x8x8xf32> to vector<2x8xf32>
    %64 = vector.shape_cast %63 : vector<2x8xf32> to vector<2x8x1xf32>
    %65 = tpu.reciprocal %64 {approx = true} : vector<2x8x1xf32> -> vector<2x8x1xf32>
    %66 = vector.broadcast %65 : vector<2x8x1xf32> to vector<2x8x8xf32>
    %67 = arith.mulf %62, %66 : vector<2x8x8xf32>
    "tpu.trace_start"() <{level = 10 : i32, message = "bqk,bkd->bqd"}> : () -> ()
    %cst_31 = arith.constant dense<0.000000e+00> : vector<2x8x8xf32>
    %68 = tpu.matmul %67, %56, %cst_31 {dimension_numbers = #tpu.dot_dimension_numbers<[2], [1], [1], [2], [0, 0, 0, 1, 1, 2], [0], [0]>} : vector<2x8x8xf32>, vector<2x8x8xf32>, vector<2x8x8xf32> -> vector<2x8x8xf32>
    "tpu.trace_stop"() : () -> ()
    %69 = vector.extract_strided_slice %21 {offsets = [0, 0, 24], sizes = [2, 8, 8], strides = [1, 1, 1]} : vector<2x8x32xf32> to vector<2x8x8xf32>
    %70 = vector.extract_strided_slice %22 {offsets = [0, 0, 24], sizes = [2, 8, 8], strides = [1, 1, 1]} : vector<2x8x32xf32> to vector<2x8x8xf32>
    %71 = vector.extract_strided_slice %23 {offsets = [0, 0, 24], sizes = [2, 8, 8], strides = [1, 1, 1]} : vector<2x8x32xf32> to vector<2x8x8xf32>
    "tpu.trace_start"() <{level = 10 : i32, message = "bqd,bkd->bqk"}> : () -> ()
    %cst_32 = arith.constant dense<0.000000e+00> : vector<2x8x8xf32>
    %72 = tpu.matmul %69, %70, %cst_32 {dimension_numbers = #tpu.dot_dimension_numbers<[2], [2], [1], [1], [0, 0, 0, 1, 1, 1], [0], [0]>} : vector<2x8x8xf32>, vector<2x8x8xf32>, vector<2x8x8xf32> -> vector<2x8x8xf32>
    "tpu.trace_stop"() : () -> ()
    %cst_33 = arith.constant dense<0xFF800000> : vector<2x8xf32>
    %73 = vector.multi_reduction <maximumf>, %72, %cst_33 [2] : vector<2x8x8xf32> to vector<2x8xf32>
    %74 = vector.shape_cast %73 : vector<2x8xf32> to vector<2x8x1xf32>
    %75 = vector.broadcast %74 : vector<2x8x1xf32> to vector<2x8x8xf32>
    %76 = arith.subf %72, %75 : vector<2x8x8xf32>
    %77 = math.exp %76 : vector<2x8x8xf32>
    %cst_34 = arith.constant dense<0.000000e+00> : vector<2x8xf32>
    %78 = vector.multi_reduction <add>, %77, %cst_34 [2] : vector<2x8x8xf32> to vector<2x8xf32>
    %79 = vector.shape_cast %78 : vector<2x8xf32> to vector<2x8x1xf32>
    %80 = tpu.reciprocal %79 {approx = true} : vector<2x8x1xf32> -> vector<2x8x1xf32>
    %81 = vector.broadcast %80 : vector<2x8x1xf32> to vector<2x8x8xf32>
    %82 = arith.mulf %77, %81 : vector<2x8x8xf32>
    "tpu.trace_start"() <{level = 10 : i32, message = "bqk,bkd->bqd"}> : () -> ()
    %cst_35 = arith.constant dense<0.000000e+00> : vector<2x8x8xf32>
    %83 = tpu.matmul %82, %71, %cst_35 {dimension_numbers = #tpu.dot_dimension_numbers<[2], [1], [1], [2], [0, 0, 0, 1, 1, 2], [0], [0]>} : vector<2x8x8xf32>, vector<2x8x8xf32>, vector<2x8x8xf32> -> vector<2x8x8xf32>
    "tpu.trace_stop"() : () -> ()
    %84 = tpu.concatenate %38, %53, %68, %83 in 2 : vector<2x8x8xf32>, vector<2x8x8xf32>, vector<2x8x8xf32>, vector<2x8x8xf32> -> vector<2x8x32xf32>
    %c0_36 = arith.constant 0 : index
    %c0_37 = arith.constant 0 : index
    %c0_38 = arith.constant 0 : index
    %85 = vector.load %arg9[%c0_36, %c0_37, %c0_38] : memref<2x8x32xf32, #tpu.memory_space<vmem>>, vector<2x8x32xf32>
    tpu.vector_store %arg9[%c0_36, %c0_37, %c0_38], %84 {strides = array<i32>} : memref<2x8x32xf32, #tpu.memory_space<vmem>>, vector<2x8x32xf32>,
    return
  }
  func.func @transform_0(%arg0: i32) -> (i32, i32, i32) {
    %c0_i32 = arith.constant 0 : i32
    %c0_i32_0 = arith.constant 0 : i32
    %c0_i32_1 = arith.constant 0 : i32
    return %arg0, %c0_i32, %c0_i32_0 : i32, i32, i32
  }
  func.func @transform_1(%arg0: i32) -> (i32, i32, i32) {
    %c0_i32 = arith.constant 0 : i32
    %c0_i32_0 = arith.constant 0 : i32
    %c0_i32_1 = arith.constant 0 : i32
    return %arg0, %c0_i32, %c0_i32_0 : i32, i32, i32
  }
  func.func @transform_2(%arg0: i32) -> (i32, i32) {
    %c0_i32 = arith.constant 0 : i32
    %c0_i32_0 = arith.constant 0 : i32
    %c0_i32_1 = arith.constant 0 : i32
    return %c0_i32, %c0_i32_0 : i32, i32
  }
  func.func @transform_3(%arg0: i32) -> (i32, i32) {
    %c0_i32 = arith.constant 0 : i32
    %c0_i32_0 = arith.constant 0 : i32
    %c0_i32_1 = arith.constant 0 : i32
    return %c0_i32, %c0_i32_0 : i32, i32
  }
  func.func @transform_4(%arg0: i32) -> (i32, i32) {
    %c0_i32 = arith.constant 0 : i32
    %c0_i32_0 = arith.constant 0 : i32
    %c0_i32_1 = arith.constant 0 : i32
    return %c0_i32, %c0_i32_0 : i32, i32
  }
  func.func @transform_5(%arg0: i32) -> (i32, i32) {
    %c0_i32 = arith.constant 0 : i32
    %c0_i32_0 = arith.constant 0 : i32
    %c0_i32_1 = arith.constant 0 : i32
    return %c0_i32, %c0_i32_0 : i32, i32
  }
  func.func @transform_6(%arg0: i32) -> (i32, i32) {
    %c0_i32 = arith.constant 0 : i32
    %c0_i32_0 = arith.constant 0 : i32
    %c0_i32_1 = arith.constant 0 : i32
    return %c0_i32, %c0_i32_0 : i32, i32
  }
  func.func @transform_7(%arg0: i32) -> (i32, i32) {
    %c0_i32 = arith.constant 0 : i32
    %c0_i32_0 = arith.constant 0 : i32
    %c0_i32_1 = arith.constant 0 : i32
    return %c0_i32, %c0_i32_0 : i32, i32
  }
  func.func @transform_8(%arg0: i32) -> (i32, i32, i32) {
    %c0_i32 = arith.constant 0 : i32
    %c0_i32_0 = arith.constant 0 : i32
    %c0_i32_1 = arith.constant 0 : i32
    return %arg0, %c0_i32, %c0_i32_0 : i32, i32, i32
  }
}

</mosaic_0001>

<bundles_post_ra>
// kernel: tpu_custom_call.1
= control target key start
LH: loop header
LB: loop body
LE: loop exit
PB: predicated region body
PF: predicated region fallthrough
CT: control target
= control target key end

     0   :  { %13 = vsyncpa [#allocation3], 0  ;;  %s2487_s0 = inlined_call_operand.hbm [shape: f32[2,8,32], index: 0, kind: input, shape index: {}]   ;;  %s2488_s1 = inlined_call_operand.hbm [shape: f32[2,8,32], index: 1, kind: input, shape index: {}]   ;;  %s2489_s2 = inlined_call_operand.hbm [shape: f32[32,32], index: 2, kind: input, shape index: {}]   ;;  %s2490_s3 = inlined_call_operand.hbm [shape: f32[32,32], index: 3, kind: input, shape index: {}]   ;;  %s2491_s4 = inlined_call_operand.hbm [shape: f32[32,32], index: 4, kind: input, shape index: {}]   ;;  %s2492_s5 = inlined_call_operand.vmem [shape: f32[1,32], index: 5, kind: input, shape index: {}]   ;;  %s2493_s6 = inlined_call_operand.vmem [shape: f32[1,32], index: 6, kind: input, shape index: {}]   ;;  %s2494_s7 = inlined_call_operand.vmem [shape: f32[1,32], index: 7, kind: input, shape index: {}]   ;;  %s2495_s8 = inlined_call_operand.hbm [shape: f32[2,8,32], index: 8, kind: output, shape index: {}]  }
   0x1   :  { %14 = vsyncpa [#allocation6], 0 }
   0x2   :  { %15 = vsyncpa [#allocation9], 0 }
   0x3   :  { %16 = vsyncpa [#allocation4], 0  ;;  %s2148_s27 = smov [#allocation5]   ;;  %s2149_s29 = smov [#allocation8]  }
   0x4   :  { %s34_s28 = sshll.u32 %s2148_s27, 4  ;;  %s58_s30 = sshll.u32 %s2149_s29, 4  ;;  %s35_s28 = int_to_ptr.vmem [resolvable:$true] %s34_s28  ;;  %s2208_s30 = int_to_ptr.vmem [resolvable:$true] %s58_s30 }
   0x5   :  { %s2008_s11 = scalar_lea.hbm %s2488_s1, 256 }
   0x6   :  { %p2009_p0 = scmp.ne.s32.totalorder %s2488_s1, %s2008_s11  ;;  %p2012_p1 = scmp.lt.u32.totalorder %s2008_s11, %s2488_s1 }
   0x8   :  { %p2014_p2 = pnand %p2012_p1, %p2009_p0 }
   0xa   :  { %2017 = shalt.err (!%p2014_p2)
}
   0xb   :  { %s2018_s16 = scalar_lea.vmem %s35_s28, 256  ;;  %p2023_p4 = scmp.lt.s32.totalorder %s35_s28, %s35_s28 }
   0xc   :  { %p2019_p3 = scmp.ne.s32.totalorder %s35_s28, %s2018_s16  ;;  %p2024_p5 = scmp.lt.s32.totalorder %s2018_s16, %s2018_s16 }
   0xe   :  { %p2025_p6 = por %p2024_p5, %p2023_p4 }
  0x10   :  { %p2026_p7 = pnand %p2025_p6, %p2019_p3 }
  0x12   :  { %2029 = shalt.err (!%p2026_p7)
}
  0x13   :  { %s2150_s17 = smov 128   ;;  %s2151_s18 = smov 8  }
  0x14   :  { %40 = dma.hbm_to_vmem [thread:$0]  %s2488_s1, 256, %s35_s28, [#allocation6], %s2150_s17, %s2150_s17, %s2151_s18  }
  0x15   :  { %s2030_s23 = scalar_lea.hbm %s2490_s3, 512 }
  0x16   :  { %p2031_p8 = scmp.ne.s32.totalorder %s2490_s3, %s2030_s23  ;;  %p2034_p9 = scmp.lt.u32.totalorder %s2030_s23, %s2490_s3 }
  0x18   :  { %p2036_p10 = pnand %p2034_p9, %p2031_p8 }
  0x1a   :  { %2039 = shalt.err (!%p2036_p10)
}
  0x1b   :  { %s2040_s29 = scalar_lea.vmem %s2208_s30, 512  ;;  %p2045_p12 = scmp.lt.s32.totalorder %s2208_s30, %s2208_s30 }
  0x1c   :  { %p2041_p11 = scmp.ne.s32.totalorder %s2208_s30, %s2040_s29  ;;  %p2046_p13 = scmp.lt.s32.totalorder %s2040_s29, %s2040_s29 }
  0x1e   :  { %p2047_p0 = por %p2046_p13, %p2045_p12 }
  0x20   :  { %p2048_p1 = pnand %p2047_p0, %p2041_p11 }
  0x22   :  { %2051 = shalt.err (!%p2048_p1)
}
  0x23   :  { %64 = dma.hbm_to_vmem [thread:$0]  %s2490_s3, 512, %s2208_s30, [#allocation9], %s2150_s17, %s2150_s17, %s2151_s18  }
  0x24   :  { %s2152_s9 = smov [#allocation2]   ;;  %s2153_s11 = smov [#allocation7]  }
  0x25   :  { %s22_s10 = sshll.u32 %s2152_s9, 4  ;;  %s46_s12 = sshll.u32 %s2153_s11, 4  ;;  %s23_s10 = int_to_ptr.vmem [resolvable:$true] %s22_s10  ;;  %s2245_s12 = int_to_ptr.vmem [resolvable:$true] %s46_s12 }
  0x26   :  { %s2052_s15 = scalar_lea.hbm %s2487_s0, 256 }
  0x27   :  { %p2053_p2 = scmp.ne.s32.totalorder %s2487_s0, %s2052_s15  ;;  %p2056_p3 = scmp.lt.u32.totalorder %s2052_s15, %s2487_s0 }
  0x29   :  { %p2058_p4 = pnand %p2056_p3, %p2053_p2 }
  0x2b   :  { %2061 = shalt.err (!%p2058_p4)
}
  0x2c   :  { %s2062_s3 = scalar_lea.vmem %s23_s10, 256  ;;  %p2067_p6 = scmp.lt.s32.totalorder %s23_s10, %s23_s10 }
  0x2d   :  { %p2063_p5 = scmp.ne.s32.totalorder %s23_s10, %s2062_s3  ;;  %p2068_p7 = scmp.lt.s32.totalorder %s2062_s3, %s2062_s3 }
  0x2f   :  { %p2069_p8 = por %p2068_p7, %p2067_p6 }
  0x31   :  { %p2070_p9 = pnand %p2069_p8, %p2063_p5 }
  0x33   :  { %2073 = shalt.err (!%p2070_p9)
}
  0x34   :  { %28 = dma.hbm_to_vmem [thread:$0]  %s2487_s0, 256, %s23_s10, [#allocation3], %s2150_s17, %s2150_s17, %s2151_s18  }
  0x35   :  { %s2074_s25 = scalar_lea.hbm %s2489_s2, 512 }
  0x36   :  { %p2075_p10 = scmp.ne.s32.totalorder %s2489_s2, %s2074_s25  ;;  %p2078_p11 = scmp.lt.u32.totalorder %s2074_s25, %s2489_s2 }
  0x38   :  { %p2080_p12 = pnand %p2078_p11, %p2075_p10 }
  0x3a   :  { %2083 = shalt.err (!%p2080_p12)
}
  0x3b   :  { %s2084_s28 = scalar_lea.vmem %s2245_s12, 512  ;;  %p2089_p0 = scmp.lt.s32.totalorder %s2245_s12, %s2245_s12 }
  0x3c   :  { %p2085_p13 = scmp.ne.s32.totalorder %s2245_s12, %s2084_s28  ;;  %p2090_p1 = scmp.lt.s32.totalorder %s2084_s28, %s2084_s28 }
  0x3e   :  { %p2091_p2 = por %p2090_p1, %p2089_p0 }
  0x40   :  { %p2092_p3 = pnand %p2091_p2, %p2085_p13 }
  0x42   :  { %2095 = shalt.err (!%p2092_p3)
}
  0x43   :  { %52 = dma.hbm_to_vmem [thread:$0]  %s2489_s2, 512, %s2245_s12, [#allocation6], %s2150_s17, %s2150_s17, %s2151_s18  }
  0x44   :  { %s2154_s10 = smov [#allocation10]   ;;  %s2096_s15 = scalar_lea.hbm %s2491_s4, 512 }
  0x45   :  { %s70_s11 = sshll.u32 %s2154_s10, 4  ;;  %p2097_p4 = scmp.ne.s32.totalorder %s2491_s4, %s2096_s15  ;;  %s71_s11 = int_to_ptr.vmem [resolvable:$true] %s70_s11 }
  0x46   :  { %p2100_p5 = scmp.lt.u32.totalorder %s2096_s15, %s2491_s4 }
  0x48   :  { %p2102_p6 = pnand %p2100_p5, %p2097_p4 }
  0x4a   :  { %2105 = shalt.err (!%p2102_p6)
}
  0x4b   :  { %s2106_s3 = scalar_lea.vmem %s71_s11, 512  ;;  %p2111_p8 = scmp.lt.s32.totalorder %s71_s11, %s71_s11 }
  0x4c   :  { %p2107_p7 = scmp.ne.s32.totalorder %s71_s11, %s2106_s3  ;;  %p2112_p9 = scmp.lt.s32.totalorder %s2106_s3, %s2106_s3 }
  0x4e   :  { %p2113_p10 = por %p2112_p9, %p2111_p8 }
  0x50   :  { %p2114_p11 = pnand %p2113_p10, %p2107_p7 }
  0x52   :  { %2117 = shalt.err (!%p2114_p11)
}
  0x53   :  { %76 = dma.hbm_to_vmem [thread:$0]  %s2491_s4, 512, %s71_s11, [#allocation9], %s2150_s17, %s2150_s17, %s2151_s18  }
  0x54   :  { %2140 = dma.done.wait [#allocation3], 256  }
  0x55   :  { %2141 = vsyncadd [#allocation3], 4294967040 }
  0x56   :  { %2142 = dma.done.wait [#allocation6], 768  }
  0x57   :  { %2143 = vsyncadd [#allocation6], 4294966528 }
  0x58   :  { %2144 = dma.done.wait [#allocation9], 1024  }
  0x59   :  { %2145 = vsyncadd [#allocation9], 4294966272  ;;  %v106_v0 = vld [vmem:[#allocation8] sm:$0xff]  ;;  %v107_v1 = vld [vmem:[#allocation8 + $0x8] sm:$0xff]  ;;  %vm121_vm0 = vcmask 261120   ;;  %v2155_v16 = vmov 0.0  }
  0x5a   :  { %v102_v2 = vld [vmem:[#allocation7] sm:$0xff]  ;;  %v1945_v3 = vpack.c.bf16 %v107_v1, %v106_v0  ;;  %v103_v4 = vld [vmem:[#allocation7 + $0x8] sm:$0xff]  ;;  %v108_v5 = vld [vmem:[#allocation8 + $0x10] sm:$0xff]  ;;  %vm2156_vm1 = vmmov 0   ;;  %vm375_vm2 = vcmask 64512   ;;  %s2157_s24 = smov 120  }
  0x5b   :  { %v109_v6 = vld [vmem:[#allocation8 + $0x18] sm:$0xff]  ;;  %v1937_v7 = vpack.c.bf16 %v103_v4, %v102_v2  ;;  %v104_v9 = vld [vmem:[#allocation7 + $0x10] sm:$0xff]  ;;  %v98_v13 = vld [vmem:[#allocation2] sm:$0xff]  ;;  %s2159_s25 = smov 104   ;;  %s2160_s26 = smov 16   ;;  %vm1717_vm3 = vcmask 195584  }
  0x5c   :  { %v1949_v8 = vpack.c.bf16 %v109_v6, %v108_v5  ;;  %v105_v10 = vld [vmem:[#allocation7 + $0x18] sm:$0xff]  ;;  %v100_v11 = vld [vmem:[#allocation5] sm:$0xff]  ;;  %1946 = vmatprep.subr.bf16.mxu1 %v1945_v3  ;;  %1832 = vmatprep.mubr.msk.f32.mxu0 %vm121_vm0, %v98_v13  ;;  %v99_v15 = vld [vmem:[#allocation2 + $0x8] sm:$0xff]  ;;  %s2161_s27 = smov 24   ;;  %vm1714_vm4 = vcmask 130048   ;;  %s2162_s29 = smov [#allocation11]  }
  0x5d   :  { %v1941_v12 = vpack.c.bf16 %v105_v10, %v104_v9  ;;  %1843 = vmatprep.mubr.msk.f32.mxu1 %vm121_vm0, %v100_v11  ;;  %1938 = vmatprep.subr.bf16.mxu0 %v1937_v7  ;;  %v101_v14 = vld [vmem:[#allocation5 + $0x8] sm:$0xff]  ;;  %v1744_v17 = vld [vmem:[%s2493_s6] ss:$0 sm:$0xff]  ;;  %v111_v30 = vld [vmem:[#allocation10 + $0x8] sm:$0xff]  ;;  %s1727_s1 = sshll.u32 %s2162_s29, 4  ;;  %s1728_s1 = int_to_ptr.vmem [resolvable:$true] %s1727_s1 }
  0x5e   :  { %1948 = vmatpush3.bf16.msra.mxu1 %v1945_v3  ;;  %1940 = vmatpush3.bf16.msra.mxu0 %v1937_v7  ;;  %v1741_v19 = vld [vmem:[%s2492_s5] ss:$0 sm:$0xff]  ;;  %v112_v31 = vld [vmem:[#allocation10 + $0x10] sm:$0xff]  ;;  %v113_v33 = vld [vmem:[#allocation10 + $0x18] sm:$0xff]  ;;  %s2118_s28 = scalar_lea.vmem %s1728_s1, 256  ;;  %p2123_p13 = scmp.lt.s32.totalorder %s1728_s1, %s1728_s1 }
  0x5f   :  { %1950 = vmatprep.subr.bf16.mxu1 %v1949_v8  ;;  %1942 = vmatprep.subr.bf16.mxu0 %v1941_v12  ;;  %v110_v29 = vld [vmem:[#allocation10] sm:$0xff]  ;;  %v1957_v34 = vpack.c.bf16 %v113_v33, %v112_v31  ;;  %p2119_p12 = scmp.ne.s32.totalorder %s1728_s1, %s2118_s28  ;;  %p2124_p0 = scmp.lt.s32.totalorder %s2118_s28, %s2118_s28 }
  0x60   :  { %v1953_v32 = vpack.c.bf16 %v111_v30, %v110_v29  ;;  %v1747_v52 = vld [vmem:[%s2494_s7] ss:$0 sm:$0xff]  ;;  %s2158_s7 = smov 112  }
  0x61   :  { %p2125_p1 = por %p2124_p0, %p2123_p13 }
  0x62   :  { %1952 = vmatpush3.bf16.msra.mxu1 %v1949_v8  ;;  %1944 = vmatpush3.bf16.msra.mxu0 %v1941_v12 }
  0x63   :  { %1857 = vmatprep.subr.mxu1 %v2155_v16  ;;  %1954 = vmatprep.subr.bf16.mxu0 %v1953_v32  ;;  %p2126_p2 = pnand %p2125_p1, %p2119_p12 }
  0x65   :  { %1844 = vmatmul.mubr.msk.f32.vlgmr.msra.gmra.mrb[0].mxu1 %vm121_vm0, %v101_v14  ;;  %1833 = vmatmul.mubr.msk.f32.vlgmr.msra.gmra.mrb[0].mxu0 %vm121_vm0, %v99_v15 }
  0x66   :  { %1854 = vmatprep.mubr.msk.f32.mxu0 %vm121_vm0, %v100_v11  ;;  %1859 = vmatprep.mubr.msk.f32.mxu1 %vm2156_vm1, %v2155_v16 }
  0x67   :  { %1956 = vmatpush3.bf16.msra.mxu0 %v1953_v32 }
  0x68   :  { %1958 = vmatprep.subr.bf16.mxu0 %v1957_v34 }
  0x6b   :  { %1960 = vmatpush3.bf16.msra.mxu0 %v1957_v34 }
  0x6c   :  { %1867 = vmatprep.subr.mxu0 %v2155_v16 }
  0x6e   :  { %1855 = vmatmul.mubr.msk.f32.vlgmr.msra.gmra.mrb[2].mxu0 %vm121_vm0, %v101_v14 }
  0x6f   :  { %1869 = vmatprep.mubr.msk.f32.mxu0 %vm2156_vm1, %v2155_v16 }
 0x138   :  { %v1845_v18 = vpop.f32.mrb[0].mxu1  ;;  %v1834_v21 = vpop.f32.mrb[0].mxu0 }
 0x139   :  { %v2311_v20 = vadd.f32 %v1845_v18, %v1744_v17  ;;  %v282_v22 = vpop.f32.mrb[1].mxu1  ;;  %v194_v24 = vpop.f32.mrb[1].mxu0  ;;  %v200_v26 = vadd.f32 %v1834_v21, %v1741_v19 }
 0x13a   :  { %v2313_v23 = vadd.f32 %v1744_v17, %v282_v22  ;;  %v195_v25 = vadd.f32 %v1741_v19, %v194_v24 }
 0x13b   :  { %776 = vrot.lane.b32.xlu1 %v2311_v20, %s2157_s24  ;;  %v2330_v28 = vmul.f32 0.35355338, %v200_v26 }
 0x13c   :  { %1858 = vmatpush3.xpose.msk.msra.mxu1 %vm375_vm2, %v2313_v23  ;;  %v2319_v27 = vmul.f32 0.35355338, %v195_v25 }
 0x13d   :  { %1862 = vmatprep.subr.mxu1 %v2155_v16 }
 0x13f   :  { %696 = vrot.lane.b32.xlu1 %v2319_v27, %s2157_s24  ;;  %1860 = vmatmul.mubr.msk.f32.vlgmr.msra.gmra.mrb[2].mxu1 %vm375_vm2, %v2319_v27 }
 0x140   :  { %1863 = vmatpush3.xpose.msk.msra.mxu1 %vm375_vm2, %v2311_v20  ;;  %1864 = vmatprep.mubr.msk.f32.mxu1 %vm2156_vm1, %v2155_v16 }
 0x141   :  { %1872 = vmatprep.subr.mxu1 %v2155_v16  ;;  %v1856_v51 = vpop.f32.mrb[2].mxu0 }
 0x142   :  { %v364_v53 = vpop.f32.mrb[3].mxu0  ;;  %v2350_v54 = vadd.f32 %v1856_v51, %v1747_v52 }
 0x143   :  { %1865 = vmatmul.mubr.msk.f32.vlgmr.msra.gmra.mrb[4].mxu1 %vm375_vm2, %v2330_v28  ;;  %v2352_v55 = vadd.f32 %v1747_v52, %v364_v53 }
 0x144   :  { %1874 = vmatprep.mubr.msk.f32.mxu1 %vm2156_vm1, %v2155_v16  ;;  %1873 = vmatpush3.msra.mxu1 %v2350_v54 }
 0x145   :  { %1868 = vmatpush3.msra.mxu0 %v2352_v55  ;;  %1882 = vmatprep.subr.mxu1 %v2155_v16 }
 0x146   :  { %1877 = vmatprep.subr.mxu0 %v2155_v16 }
 0x1ad   :  { %v777_v56 = vpop.permute.xlu1 %776 }
 0x1b1   :  { %v697_v57 = vpop.permute.xlu1 %696 }
 0x212   :  { %v448_v35 = vpop.f32.mrb[2].mxu1 }
 0x213   :  { %v1861_v36 = vpop.f32.mrb[3].mxu1  ;;  %v528_v37 = vsel %vm375_vm2, %v448_v35, -inf }
 0x214   :  { %529 = vmax.xlane.f32.xlu0 %v528_v37 }
 0x216   :  { %v524_v38 = vpop.f32.mrb[4].mxu1 }
 0x217   :  { %v1866_v39 = vpop.f32.mrb[5].mxu1  ;;  %v531_v40 = vsel %vm375_vm2, %v524_v38, -inf }
 0x218   :  { %532 = vmax.xlane.f32.xlu0 %v531_v40 }
 0x22e   :  { %698 = vrot.lane.b32.xlu0 %v2313_v23, %s2157_s24 }
 0x2a1   :  { %v530_v41 = vpop.xlane.xlu0 %529 }
 0x2a2   :  { %v534_v42 = vsub.f32 %v448_v35, %v530_v41 }
 0x2a4   :  { %v536_v43 = vmul.f32 1.442695, %v534_v42 }
 0x2a5   :  { %v533_v44 = vpop.xlane.xlu0 %532 }
 0x2a6   :  { %1976 = vpow2.f32 %v536_v43  ;;  %v535_v45 = vsub.f32 %v524_v38, %v533_v44 }
 0x2a8   :  { %v538_v46 = vmul.f32 1.442695, %v535_v45 }
 0x2a9   :  { %v699_v62 = vpop.permute.xlu0 %698 }
 0x2aa   :  { %1978 = vpow2.f32 %v538_v46 }
 0x2b0   :  { %v1977_v47 = vpop.eup %1976 }
 0x2b1   :  { %v540_v48 = vsel %vm375_vm2, %v1977_v47, 0.0 }
 0x2b2   :  { %541 = vadd.xlane.f32.xlu1 %v540_v48 }
 0x2b4   :  { %v1979_v49 = vpop.eup %1978 }
 0x2b5   :  { %v543_v50 = vsel %vm375_vm2, %v1979_v49, 0.0 }
 0x2b6   :  { %544 = vadd.xlane.f32.xlu1 %v543_v50 }
 0x2c7   :  { %774 = vrot.lane.b32.xlu1 %v2330_v28, %s2157_s24 }
 0x33f   :  { %v542_v58 = vpop.xlane.xlu1 %541 }
 0x340   :  { %1980 = vrcp.f32 %v542_v58 }
 0x343   :  { %v545_v59 = vpop.xlane.xlu1 %544 }
 0x344   :  { %1982 = vrcp.f32 %v545_v59 }
 0x347   :  { %v775_v1 = vpop.permute.xlu1 %774 }
 0x34a   :  { %v1981_v60 = vpop.eup %1980 }
 0x34b   :  { %v548_v61 = vmul.f32 %v1981_v60, %v1977_v47 }
 0x34d   :  { %1870 = vmatmul.mubr.msk.f32.vlgmr.msra.gmra.mrb[4].mxu0 %vm375_vm2, %v548_v61 }
 0x34e   :  { %v1983_v63 = vpop.eup %1982  ;;  %1878 = vmatpush3.xpose.msk.msra.mxu0 %vm375_vm2, %v699_v62  ;;  %1879 = vmatprep.mubr.msk.f32.mxu0 %vm2156_vm1, %v2155_v16 }
 0x34f   :  { %v549_v0 = vmul.f32 %v1983_v63, %v1979_v49  ;;  %1887 = vmatprep.subr.mxu0 %v2155_v16 }
 0x351   :  { %1875 = vmatmul.mubr.msk.f32.vlgmr.msra.gmra.mrb[6].mxu1 %vm375_vm2, %v549_v0  ;;  %1880 = vmatmul.mubr.msk.f32.vlgmr.msra.gmra.mrb[6].mxu0 %vm375_vm2, %v697_v57 }
 0x352   :  { %1883 = vmatpush3.xpose.msk.msra.mxu1 %vm375_vm2, %v777_v56  ;;  %1884 = vmatprep.mubr.msk.f32.mxu1 %vm2156_vm1, %v2155_v16 }
 0x353   :  { %1892 = vmatprep.subr.mxu1 %v2155_v16  ;;  %1889 = vmatprep.mubr.msk.f32.mxu0 %vm2156_vm1, %v2155_v16 }
 0x355   :  { %1885 = vmatmul.mubr.msk.f32.vlgmr.msra.gmra.mrb[8].mxu1 %vm375_vm2, %v775_v1 }
 0x356   :  { %1894 = vmatprep.mubr.msk.f32.mxu1 %vm2156_vm1, %v2155_v16 }
 0x420   :  { %v2376_v2 = vpop.f32.mrb[4].mxu0 }
 0x421   :  { %v1871_v3 = vpop.f32.mrb[5].mxu0 }
 0x424   :  { %v2378_v4 = vpop.f32.mrb[6].mxu1  ;;  %v770_v5 = vpop.f32.mrb[6].mxu0 }
 0x425   :  { %v1876_v6 = vpop.f32.mrb[7].mxu1  ;;  %v1881_v7 = vpop.f32.mrb[7].mxu0  ;;  %v852_v8 = vsel %vm375_vm2, %v770_v5, -inf }
 0x426   :  { %853 = vmax.xlane.f32.xlu0 %v852_v8 }
 0x428   :  { %v848_v9 = vpop.f32.mrb[8].mxu1 }
 0x429   :  { %v1886_v10 = vpop.f32.mrb[9].mxu1  ;;  %v855_v11 = vsel %vm375_vm2, %v848_v9, -inf }
 0x42a   :  { %856 = vmax.xlane.f32.xlu1 %v855_v11 }
 0x43b   :  { %952 = vrot.lane.b32.xlu1 %v2350_v54, %s2157_s24 }
 0x43c   :  { %875 = vrot.lane.b32.xlu0 %v2352_v55, %s2157_s24 }
 0x43f   :  { %1030 = vrot.lane.b32.xlu1 %v2313_v23, %s2158_s7 }
 0x443   :  { %1108 = vrot.lane.b32.xlu1 %v2311_v20, %s2158_s7 }
 0x447   :  { %1106 = vrot.lane.b32.xlu1 %v2330_v28, %s2158_s7 }
 0x4b3   :  { %v854_v12 = vpop.xlane.xlu0 %853 }
 0x4b4   :  { %v858_v13 = vsub.f32 %v770_v5, %v854_v12 }
 0x4b6   :  { %v860_v14 = vmul.f32 1.442695, %v858_v13 }
 0x4b7   :  { %v876_v15 = vpop.permute.xlu0 %875  ;;  %v857_v17 = vpop.xlane.xlu1 %856 }
 0x4b8   :  { %1984 = vpow2.f32 %v860_v14  ;;  %v859_v18 = vsub.f32 %v848_v9, %v857_v17  ;;  %1888 = vmatpush3.msra.mxu0 %v876_v15 }
 0x4b9   :  { %1897 = vmatprep.subr.mxu0 %v2155_v16 }
 0x4ba   :  { %v862_v19 = vmul.f32 1.442695, %v859_v18 }
 0x4bb   :  { %v953_v21 = vpop.permute.xlu1 %952 }
 0x4bc   :  { %1986 = vpow2.f32 %v862_v19  ;;  %1893 = vmatpush3.msra.mxu1 %v953_v21 }
 0x4bd   :  { %1902 = vmatprep.subr.mxu1 %v2155_v16 }
 0x4bf   :  { %v1031_v31 = vpop.permute.xlu1 %1030 }
 0x4c2   :  { %v1985_v22 = vpop.eup %1984 }
 0x4c3   :  { %v864_v24 = vsel %vm375_vm2, %v1985_v22, 0.0  ;;  %v1109_v35 = vpop.permute.xlu1 %1108 }
 0x4c4   :  { %865 = vadd.xlane.f32.xlu0 %v864_v24 }
 0x4c6   :  { %v1987_v25 = vpop.eup %1986 }
 0x4c7   :  { %v867_v26 = vsel %vm375_vm2, %v1987_v25, 0.0  ;;  %v1107_v38 = vpop.permute.xlu1 %1106 }
 0x4c8   :  { %868 = vadd.xlane.f32.xlu0 %v867_v26 }
 0x4de   :  { %1028 = vrot.lane.b32.xlu0 %v2319_v27, %s2158_s7 }
 0x551   :  { %v866_v29 = vpop.xlane.xlu0 %865 }
 0x552   :  { %1988 = vrcp.f32 %v866_v29 }
 0x555   :  { %v869_v30 = vpop.xlane.xlu0 %868 }
 0x556   :  { %1990 = vrcp.f32 %v869_v30 }
 0x559   :  { %v1029_v37 = vpop.permute.xlu0 %1028 }
 0x55c   :  { %v1989_v32 = vpop.eup %1988 }
 0x55d   :  { %v872_v33 = vmul.f32 %v1989_v32, %v1985_v22 }
 0x55f   :  { %1890 = vmatmul.mubr.msk.f32.vlgmr.msra.gmra.mrb[8].mxu0 %vm375_vm2, %v872_v33 }
 0x560   :  { %v1991_v34 = vpop.eup %1990  ;;  %1898 = vmatpush3.xpose.msk.msra.mxu0 %vm375_vm2, %v1031_v31  ;;  %1899 = vmatprep.mubr.msk.f32.mxu0 %vm2156_vm1, %v2155_v16 }
 0x561   :  { %v873_v36 = vmul.f32 %v1991_v34, %v1987_v25  ;;  %1907 = vmatprep.subr.mxu0 %v2155_v16 }
 0x563   :  { %1895 = vmatmul.mubr.msk.f32.vlgmr.msra.gmra.mrb[10].mxu1 %vm375_vm2, %v873_v36  ;;  %1900 = vmatmul.mubr.msk.f32.vlgmr.msra.gmra.mrb[10].mxu0 %vm375_vm2, %v1029_v37 }
 0x564   :  { %1903 = vmatpush3.xpose.msk.msra.mxu1 %vm375_vm2, %v1109_v35  ;;  %1904 = vmatprep.mubr.msk.f32.mxu1 %vm2156_vm1, %v2155_v16 }
 0x565   :  { %1912 = vmatprep.subr.mxu1 %v2155_v16  ;;  %1909 = vmatprep.mubr.msk.f32.mxu0 %vm2156_vm1, %v2155_v16 }
 0x567   :  { %1905 = vmatmul.mubr.msk.f32.vlgmr.msra.gmra.mrb[12].mxu1 %vm375_vm2, %v1107_v38 }
 0x568   :  { %1914 = vmatprep.mubr.msk.f32.mxu1 %vm2156_vm1, %v2155_v16 }
 0x632   :  { %v2414_v39 = vpop.f32.mrb[8].mxu0 }
 0x633   :  { %v1891_v40 = vpop.f32.mrb[9].mxu0 }
 0x636   :  { %v2416_v41 = vpop.f32.mrb[10].mxu1  ;;  %v1102_v42 = vpop.f32.mrb[10].mxu0 }
 0x637   :  { %v1896_v43 = vpop.f32.mrb[11].mxu1  ;;  %v1901_v44 = vpop.f32.mrb[11].mxu0  ;;  %v1184_v45 = vsel %vm375_vm2, %v1102_v42, -inf }
 0x638   :  { %1185 = vmax.xlane.f32.xlu0 %v1184_v45 }
 0x63a   :  { %v1180_v46 = vpop.f32.mrb[12].mxu1 }
 0x63b   :  { %v1906_v47 = vpop.f32.mrb[13].mxu1  ;;  %v1187_v48 = vsel %vm375_vm2, %v1180_v46, -inf }
 0x63c   :  { %1188 = vmax.xlane.f32.xlu1 %v1187_v48 }
 0x64d   :  { %1282 = vrot.lane.b32.xlu1 %v2350_v54, %s2158_s7 }
 0x64e   :  { %1206 = vrot.lane.b32.xlu0 %v2352_v55, %s2158_s7 }
 0x651   :  { %1360 = vrot.lane.b32.xlu1 %v2313_v23, %s2159_s25 }
 0x655   :  { %1438 = vrot.lane.b32.xlu1 %v2311_v20, %s2159_s25 }
 0x659   :  { %1436 = vrot.lane.b32.xlu1 %v2330_v28, %s2159_s25 }
 0x6c5   :  { %v1186_v49 = vpop.xlane.xlu0 %1185 }
 0x6c6   :  { %v1190_v50 = vsub.f32 %v1102_v42, %v1186_v49 }
 0x6c8   :  { %v1192_v51 = vmul.f32 1.442695, %v1190_v50 }
 0x6c9   :  { %v1207_v52 = vpop.permute.xlu0 %1206  ;;  %v1189_v53 = vpop.xlane.xlu1 %1188 }
 0x6ca   :  { %1992 = vpow2.f32 %v1192_v51  ;;  %v1191_v56 = vsub.f32 %v1180_v46, %v1189_v53  ;;  %1908 = vmatpush3.msra.mxu0 %v1207_v52 }
 0x6cb   :  { %1917 = vmatprep.subr.mxu0 %v2155_v16 }
 0x6cc   :  { %v1194_v57 = vmul.f32 1.442695, %v1191_v56 }
 0x6cd   :  { %v1283_v58 = vpop.permute.xlu1 %1282 }
 0x6ce   :  { %1994 = vpow2.f32 %v1194_v57  ;;  %1913 = vmatpush3.msra.mxu1 %v1283_v58 }
 0x6cf   :  { %1922 = vmatprep.subr.mxu1 %v2155_v16 }
 0x6d1   :  { %v1361_v62 = vpop.permute.xlu1 %1360 }
 0x6d4   :  { %v1993_v20 = vpop.eup %1992 }
 0x6d5   :  { %v1196_v23 = vsel %vm375_vm2, %v1993_v20, 0.0  ;;  %v1439_v3 = vpop.permute.xlu1 %1438 }
 0x6d6   :  { %1197 = vadd.xlane.f32.xlu0 %v1196_v23 }
 0x6d8   :  { %v1995_v28 = vpop.eup %1994 }
 0x6d9   :  { %v1199_v59 = vsel %vm375_vm2, %v1995_v28, 0.0  ;;  %v1437_v6 = vpop.permute.xlu1 %1436 }
 0x6da   :  { %1200 = vadd.xlane.f32.xlu0 %v1199_v59 }
 0x6f0   :  { %1358 = vrot.lane.b32.xlu0 %v2319_v27, %s2159_s25 }
 0x763   :  { %v1198_v60 = vpop.xlane.xlu0 %1197 }
 0x764   :  { %1996 = vrcp.f32 %v1198_v60 }
 0x767   :  { %v1201_v61 = vpop.xlane.xlu0 %1200 }
 0x768   :  { %1998 = vrcp.f32 %v1201_v61 }
 0x76b   :  { %v1359_v27 = vpop.permute.xlu0 %1358 }
 0x76e   :  { %v1997_v63 = vpop.eup %1996 }
 0x76f   :  { %v1204_v0 = vmul.f32 %v1997_v63, %v1993_v20 }
 0x771   :  { %1910 = vmatmul.mubr.msk.f32.vlgmr.msra.gmra.mrb[12].mxu0 %vm375_vm2, %v1204_v0 }
 0x772   :  { %v1999_v1 = vpop.eup %1998  ;;  %1918 = vmatpush3.xpose.msk.msra.mxu0 %vm375_vm2, %v1361_v62  ;;  %1919 = vmatprep.mubr.msk.f32.mxu0 %vm2156_vm1, %v2155_v16 }
 0x773   :  { %v1205_v5 = vmul.f32 %v1999_v1, %v1995_v28  ;;  %1927 = vmatprep.subr.mxu0 %v2155_v16 }
 0x775   :  { %1915 = vmatmul.mubr.msk.f32.vlgmr.msra.gmra.mrb[14].mxu1 %vm375_vm2, %v1205_v5  ;;  %1920 = vmatmul.mubr.msk.f32.vlgmr.msra.gmra.mrb[14].mxu0 %vm375_vm2, %v1359_v27 }
 0x776   :  { %1923 = vmatpush3.xpose.msk.msra.mxu1 %vm375_vm2, %v1439_v3  ;;  %1924 = vmatprep.mubr.msk.f32.mxu1 %vm2156_vm1, %v2155_v16 }
 0x777   :  { %1932 = vmatprep.subr.mxu1 %v2155_v16  ;;  %1929 = vmatprep.mubr.msk.f32.mxu0 %vm2156_vm1, %v2155_v16 }
 0x779   :  { %1925 = vmatmul.mubr.msk.f32.vlgmr.msra.gmra.mrb[16].mxu1 %vm375_vm2, %v1437_v6 }
 0x77a   :  { %1934 = vmatprep.mubr.msk.f32.mxu1 %vm2156_vm1, %v2155_v16 }
 0x844   :  { %v1278_v7 = vpop.f32.mrb[12].mxu0 }
 0x845   :  { %v1911_v8 = vpop.f32.mrb[13].mxu0 }
 0x848   :  { %v1354_v9 = vpop.f32.mrb[14].mxu1  ;;  %v1432_v10 = vpop.f32.mrb[14].mxu0 }
 0x849   :  { %v1916_v11 = vpop.f32.mrb[15].mxu1  ;;  %v1921_v12 = vpop.f32.mrb[15].mxu0  ;;  %v1514_v13 = vsel %vm375_vm2, %v1432_v10, -inf }
 0x84a   :  { %1515 = vmax.xlane.f32.xlu0 %v1514_v13 }
 0x84c   :  { %v1510_v14 = vpop.f32.mrb[16].mxu1 }
 0x84d   :  { %v1926_v15 = vpop.f32.mrb[17].mxu1  ;;  %v1517_v17 = vsel %vm375_vm2, %v1510_v14, -inf }
 0x84e   :  { %1518 = vmax.xlane.f32.xlu1 %v1517_v17 }
 0x85f   :  { %1612 = vrot.lane.b32.xlu1 %v2350_v54, %s2159_s25 }
 0x863   :  { %1690 = vrot.lane.b32.xlu1 %v2414_v39, %s2151_s18 }
 0x867   :  { %1692 = vrot.lane.b32.xlu1 %v2416_v41, %s2151_s18 }
 0x86b   :  { %1700 = vrot.lane.b32.xlu1 %v1354_v9, %s2160_s26 }
 0x8d7   :  { %v1516_v16 = vpop.xlane.xlu0 %1515 }
 0x8d8   :  { %v1520_v18 = vsub.f32 %v1432_v10, %v1516_v16 }
 0x8da   :  { %v1522_v19 = vmul.f32 1.442695, %v1520_v18 }
 0x8db   :  { %v1519_v21 = vpop.xlane.xlu1 %1518 }
 0x8dc   :  { %2000 = vpow2.f32 %v1522_v19  ;;  %v1521_v22 = vsub.f32 %v1510_v14, %v1519_v21 }
 0x8de   :  { %v1524_v24 = vmul.f32 1.442695, %v1521_v22 }
 0x8df   :  { %v1613_v25 = vpop.permute.xlu1 %1612 }
 0x8e0   :  { %2002 = vpow2.f32 %v1524_v24  ;;  %1933 = vmatpush3.msra.mxu1 %v1613_v25 }
 0x8e3   :  { %v1691_v41 = vpop.permute.xlu1 %1690 }
 0x8e4   :  { %v1712_v44 = vsel %vm375_vm2, %v2376_v2, %v1691_v41 }
 0x8e6   :  { %v2001_v26 = vpop.eup %2000 }
 0x8e7   :  { %v1526_v54 = vsel %vm375_vm2, %v2001_v26, 0.0  ;;  %v1693_v42 = vpop.permute.xlu1 %1692 }
 0x8e8   :  { %1527 = vadd.xlane.f32.xlu0 %v1526_v54  ;;  %v1713_v49 = vsel %vm375_vm2, %v2378_v4, %v1693_v42 }
 0x8ea   :  { %v2003_v29 = vpop.eup %2002 }
 0x8eb   :  { %v1529_v30 = vsel %vm375_vm2, %v2003_v29, 0.0  ;;  %v1701_v45 = vpop.permute.xlu1 %1700 }
 0x8ec   :  { %1530 = vadd.xlane.f32.xlu0 %v1529_v30  ;;  %v1716_v50 = vsel %vm1714_vm4, %v1713_v49, %v1701_v45 }
 0x902   :  { %1536 = vrot.lane.b32.xlu0 %v2352_v55, %s2159_s25 }
 0x906   :  { %1698 = vrot.lane.b32.xlu0 %v1278_v7, %s2160_s26 }
 0x975   :  { %v1528_v31 = vpop.xlane.xlu0 %1527 }
 0x976   :  { %2004 = vrcp.f32 %v1528_v31 }
 0x979   :  { %v1531_v32 = vpop.xlane.xlu0 %1530 }
 0x97a   :  { %2006 = vrcp.f32 %v1531_v32 }
 0x97d   :  { %v1537_v33 = vpop.permute.xlu0 %1536 }
 0x97e   :  { %1928 = vmatpush3.msra.mxu0 %v1537_v33 }
 0x980   :  { %v2005_v34 = vpop.eup %2004 }
 0x981   :  { %v1534_v35 = vmul.f32 %v2005_v34, %v2001_v26  ;;  %v1699_v43 = vpop.permute.xlu0 %1698 }
 0x982   :  { %v1715_v46 = vsel %vm1714_vm4, %v1712_v44, %v1699_v43 }
 0x983   :  { %1930 = vmatmul.mubr.msk.f32.vlgmr.msra.gmra.mrb[16].mxu0 %vm375_vm2, %v1534_v35 }
 0x984   :  { %v2007_v36 = vpop.eup %2006 }
 0x985   :  { %v1535_v37 = vmul.f32 %v2007_v36, %v2003_v29 }
 0x987   :  { %1935 = vmatmul.mubr.msk.f32.vlgmr.msra.gmra.mrb[18].mxu1 %vm375_vm2, %v1535_v37 }
 0xa56   :  { %v1608_v38 = vpop.f32.mrb[16].mxu0 }
 0xa57   :  { %1706 = vrot.lane.b32.xlu0 %v1608_v38, %s2161_s27  ;;  %v1931_v39 = vpop.f32.mrb[17].mxu0 }
 0xa5a   :  { %v1684_v55 = vpop.f32.mrb[18].mxu1 }
 0xa5b   :  { %1708 = vrot.lane.b32.xlu1 %v1684_v55, %s2161_s27  ;;  %v1936_v40 = vpop.f32.mrb[19].mxu1 }
 0xac9   :  { %v1707_v47 = vpop.permute.xlu0 %1706 }
 0xaca   :  { %v1718_v48 = vsel %vm1717_vm3, %v1715_v46, %v1707_v47 }
 0xacb   :  { %1720 = vst.msk [vmem:[#allocation11] sm:$0xff] %vm121_vm0, %v1718_v48 }
 0xacd   :  { %v1709_v51 = vpop.permute.xlu1 %1708 }
 0xace   :  { %v1719_v52 = vsel %vm1717_vm3, %v1716_v50, %v1709_v51 }
 0xacf   :  { %1721 = vst.msk [vmem:[#allocation11 + $0x8] sm:$0xff] %vm121_vm0, %v1719_v52 }
 0xad0   :  { %2129 = shalt.err (!%p2126_p2)
}
 0xad1   :  { %s2130_s10 = scalar_lea.hbm %s2495_s8, 256 }
 0xad2   :  { %p2131_p3 = scmp.ne.s32.totalorder %s2495_s8, %s2130_s10  ;;  %p2134_p4 = scmp.lt.u32.totalorder %s2130_s10, %s2495_s8 }
 0xad4   :  { %p2136_p5 = pnand %p2134_p4, %p2131_p3 }
 0xad6   :  { %2139 = shalt.err (!%p2136_p5)
}
 0xad7   :  { %1733 = dma.vmem_to_hbm [thread:$0]  %s1728_s1, 256, %s2495_s8, [#allocation4], %s2150_s17, %s2150_s17, %s2151_s18  }
 0xad8   :  { %2146 = dma.done.wait [#allocation4], 256  }
 0xad9   :  { %2147 = vsyncadd [#allocation4], 4294967040 }
 0xada   :  { %1737 = vsyncpa [#allocation3], 1 }
 0xadb   :  { %1738 = vsyncpa [#allocation6], 1 }
 0xadc   :  { %1739 = vsyncpa [#allocation9], 1 }
 0xadd   :  { %1740 = vsyncpa [#allocation4], 1 }

</bundles_post_ra>
